<compile_context>
chip_gen: v6e
topology: v6e:2x2x1
jax: 0.10.0
libtpu: 0.0.40
codegen_flags: <defaults>
</compile_context>

<pallas_src>
import jax
import jax.numpy as jnp
from jax.experimental import pallas as pl
from jax.experimental.pallas import tpu as pltpu

_LANES = 512      # lane-dense last dim (multiple of 128) -> unmasked stores
_TILE_ROWS = 512  # 512x512 f32 tile = 1 MiB per pipeline buffer


def _exp_kernel(x_ref, o_ref):
    # Elementwise exp on a full lane-dense VMEM tile (EUP path).
    o_ref[...] = jnp.exp(x_ref[...])


def exp_map_forward(x):
    """Pallas implementation of ExpMapWithLog.forward: y = exp(x)."""
    orig_shape = x.shape
    orig_dtype = x.dtype

    n = x.size
    if n == 0:
        return x  # degenerate empty tensor

    # --- layout plumbing (pure wrapper-side reshape/pad, no compute) --------
    # Flatten, pad to a whole number of (tile_rows, _LANES) tiles, and view as
    # a 2-D slab whose last dim is a large multiple of 128.
    rows_needed = pl.cdiv(n, _LANES)
    if rows_needed >= _TILE_ROWS:
        tile_rows = _TILE_ROWS
    else:
        # Small inputs: single tile, rows rounded up to the 8-sublane minimum.
        tile_rows = 8 * pl.cdiv(rows_needed, 8)
    rows = pl.cdiv(rows_needed, tile_rows) * tile_rows
    padded_n = rows * _LANES

    x_flat = x.reshape(-1)
    if padded_n != n:
        # exp(0)=1 in the padded tail; it is sliced off after the call.
        x_flat = jnp.pad(x_flat, (0, padded_n - n))
    x2d = x_flat.reshape(rows, _LANES)

    grid = (rows // tile_rows,)

    out2d = pl.pallas_call(
        _exp_kernel,
        out_shape=jax.ShapeDtypeStruct((rows, _LANES), orig_dtype),
        grid=grid,
        in_specs=[pl.BlockSpec((tile_rows, _LANES), lambda i: (i, 0))],
        out_specs=pl.BlockSpec((tile_rows, _LANES), lambda i: (i, 0)),
        compiler_params=pltpu.CompilerParams(
            # Tiles are independent: lets v7x shard the grid across both TCs.
            dimension_semantics=("parallel",),
        ),
    )(x2d)

    return out2d.reshape(-1)[:n].reshape(orig_shape)


# TODO(synk): custom backward (grad * log(clamp(grad, 1e-10))) not implemented;
# only the forward pass y = exp(x) is required here.


if __name__ == "__main__":
    key = jax.random.PRNGKey(0)
    # Small NCHW input consistent with a conv-style module: (B=2, C=4, H=16, W=16)
    x = jax.random.normal(key, (2, 4, 16, 16), dtype=jnp.float32)

    y = exp_map_forward(x)
    jax.block_until_ready(y)

    # Correctness check against the pure-JAX reference.
    y_ref = jnp.exp(x)
    assert y.shape == x.shape and y.dtype == x.dtype
    assert jnp.allclose(y, y_ref, rtol=1e-6, atol=1e-6)

    print("KERNEL_OK")
</pallas_src>

<mosaic_0001>
module attributes {stable_mosaic.version = 11 : i64} {
  func.func @_exp_kernel(%arg0: i32, %arg1: memref<8x512xf32, #tpu.memory_space<vmem>>, %arg2: memref<8x512xf32, #tpu.memory_space<vmem>>) attributes {dimension_semantics = [#tpu.dimension_semantics<parallel>], iteration_bounds = array<i64: 1>, scalar_prefetch = 0 : i64, scratch_operands = 0 : i64, tpu.core_type = #tpu.core_type<tc>, window_params = [{transform_indices = @transform_0, window_bounds = array<i64: 8, 512>}, {transform_indices = @transform_1, window_bounds = array<i64: 8, 512>}]} {
    %c0 = arith.constant 0 : index
    %c0_0 = arith.constant 0 : index
    %0 = vector.load %arg1[%c0, %c0_0] : memref<8x512xf32, #tpu.memory_space<vmem>>, vector<8x512xf32>
    %1 = math.exp %0 : vector<8x512xf32>
    %c0_1 = arith.constant 0 : index
    %c0_2 = arith.constant 0 : index
    %2 = vector.load %arg2[%c0_1, %c0_2] : memref<8x512xf32, #tpu.memory_space<vmem>>, vector<8x512xf32>
    tpu.vector_store %arg2[%c0_1, %c0_2], %1 {strides = array<i32>} : memref<8x512xf32, #tpu.memory_space<vmem>>, vector<8x512xf32>,
    return
  }
  func.func @transform_0(%arg0: i32) -> (i32, i32) {
    %c0_i32 = arith.constant 0 : i32
    %c0_i32_0 = arith.constant 0 : i32
    return %arg0, %c0_i32 : i32, i32
  }
  func.func @transform_1(%arg0: i32) -> (i32, i32) {
    %c0_i32 = arith.constant 0 : i32
    %c0_i32_0 = arith.constant 0 : i32
    return %arg0, %c0_i32 : i32, i32
  }
}

</mosaic_0001>

<bundles_post_ra>
// kernel: tpu_custom_call.1
= control target key start
LH: loop header
LB: loop body
LE: loop exit
PB: predicated region body
PF: predicated region fallthrough
CT: control target
= control target key end

     0   :  { %6 = vsyncpa [#allocation3], 0  ;;  %s124_s0 = inlined_call_operand.hbm [shape: f32[8,512], index: 0, kind: input, shape index: {}]   ;;  %s125_s1 = inlined_call_operand.hbm [shape: f32[8,512], index: 1, kind: output, shape index: {}]  }
   0x1   :  { %7 = vsyncpa [#allocation4], 0  ;;  %s106_s6 = smov [#allocation2]  }
   0x2   :  { %s14_s7 = sshll.u32 %s106_s6, 4  ;;  %s15_s7 = int_to_ptr.vmem [resolvable:$true] %s14_s7 }
   0x3   :  { %s70_s8 = scalar_lea.vmem %s15_s7, 512  ;;  %p75_p1 = scmp.lt.s32.totalorder %s15_s7, %s15_s7 }
   0x4   :  { %p71_p0 = scmp.ne.s32.totalorder %s15_s7, %s70_s8  ;;  %p76_p2 = scmp.lt.s32.totalorder %s70_s8, %s70_s8 }
   0x6   :  { %p77_p3 = por %p76_p2, %p75_p1 }
   0x8   :  { %p78_p4 = pnand %p77_p3, %p71_p0 }
   0xa   :  { %81 = shalt.err (!%p78_p4)
}
   0xb   :  { %17 = dma.hbm_to_vmem [thread:$0]  %s124_s0, 512, %s15_s7, [#allocation3]  }
   0xc   :  { %102 = dma.done.wait [#allocation3], 512  }
   0xd   :  { %103 = vsyncadd [#allocation3], 4294966784  ;;  %v21_v0 = vld [vmem:[#allocation2] sm:$0xff]  ;;  %v22_v1 = vld [vmem:[#allocation2 + $0x8] sm:$0xff]  ;;  %s107_s11 = smov [#allocation5]  }
   0xe   :  { %v23_v2 = vld [vmem:[#allocation2 + $0x10] sm:$0xff]  ;;  %v25_v3 = vmul.f32 1.442695, %v21_v0  ;;  %v27_v4 = vmul.f32 1.442695, %v22_v1  ;;  %v24_v6 = vld [vmem:[#allocation2 + $0x18] sm:$0xff] }
   0xf   :  { %v29_v5 = vmul.f32 1.442695, %v23_v2  ;;  %v31_v7 = vmul.f32 1.442695, %v24_v6  ;;  %s43_s12 = sshll.u32 %s107_s11, 4  ;;  %s44_s12 = int_to_ptr.vmem [resolvable:$true] %s43_s12 }
  0x10   :  { %54 = vpow2.f32 %v25_v3  ;;  %s82_s0 = scalar_lea.vmem %s44_s12, 512  ;;  %p87_p6 = scmp.lt.s32.totalorder %s44_s12, %s44_s12 }
  0x11   :  { %56 = vpow2.f32 %v27_v4  ;;  %p83_p5 = scmp.ne.s32.totalorder %s44_s12, %s82_s0  ;;  %p88_p7 = scmp.lt.s32.totalorder %s82_s0, %s82_s0 }
  0x12   :  { %58 = vpow2.f32 %v29_v5 }
  0x13   :  { %60 = vpow2.f32 %v31_v7  ;;  %p89_p8 = por %p88_p7, %p87_p6 }
  0x15   :  { %p90_p9 = pnand %p89_p8, %p83_p5 }
  0x1d   :  { %v55_v8 = vpop.eup %54 }
  0x1e   :  { %v57_v9 = vpop.eup %56  ;;  %33 = vst [vmem:[#allocation5] sm:$0xff] %v55_v8 }
  0x1f   :  { %v59_v10 = vpop.eup %58  ;;  %34 = vst [vmem:[#allocation5 + $0x8] sm:$0xff] %v57_v9 }
  0x20   :  { %v61_v11 = vpop.eup %60  ;;  %35 = vst [vmem:[#allocation5 + $0x10] sm:$0xff] %v59_v10 }
  0x21   :  { %36 = vst [vmem:[#allocation5 + $0x18] sm:$0xff] %v61_v11 }
  0x22   :  { %93 = shalt.err (!%p90_p9)
}
  0x23   :  { %46 = dma.vmem_to_hbm [thread:$0]  %s44_s12, 512, %s125_s1, [#allocation4]  }
  0x24   :  { %104 = dma.done.wait [#allocation4], 512  }
  0x25   :  { %105 = vsyncadd [#allocation4], 4294966784 }
  0x26   :  { %50 = vsyncpa [#allocation3], 1 }
  0x27   :  { %51 = vsyncpa [#allocation4], 1 }

</bundles_post_ra>
